<compile_context>
chip_gen: v7x
topology: tpu7x:2x2x1
jax: 0.10.0
libtpu: 0.0.40
codegen_flags: <defaults>
</compile_context>

<pallas_src>
import functools
import math

import jax
import jax.numpy as jnp
import numpy as np
from jax import lax
from jax.experimental import pallas as pl
from jax.experimental.pallas import tpu as pltpu


def _vmem_limit_bytes():
    """Per-generation scoped-VMEM budget with headroom (v7x: 64 MiB/TC)."""
    try:
        cap = pltpu.get_tpu_info().vmem_capacity_bytes
    except Exception:
        cap = 128 * 1024 * 1024
    return int(min(80 * 1024 * 1024, (cap * 5) // 8))


def _fit(dim, pref):
    """Preferred tile when it divides `dim`, else the full extent.

    Real model dims are multiples of the preferred tiles; the untiled fallback
    keeps the (8, 128) block-layout rule valid at small/toy shapes."""
    return pref if (pref is not None and dim % pref == 0) else dim


# ----------------------------------------------------------------------------
# Shared element-wise helpers (f32 math).
# ----------------------------------------------------------------------------
def _rope_full(t, cos_full, sin_signed, hd):
    # apply_rotary_emb without slice/concat on a sub-lane boundary:
    #   cos_full   = [cos,  cos]    (rows, hd)
    #   sin_signed = [sin, -sin]    (rows, hd)
    #   roll(t, hd/2) = [t2, t1]    (XLU lane rotation; off the VALU path)
    return t * cos_full + pltpu.roll(t, shift=hd // 2, axis=1) * sin_signed


def _rms(t, eps):
    # RMSNorm without trainable weight, computed in f32 (matches the module).
    return t * lax.rsqrt(jnp.mean(t * t, axis=-1, keepdims=True) + eps)


# ----------------------------------------------------------------------------
# Kernel 1: fused per-head QKV projection + rope + temperature + QKNorm.
#   x (B, L, D) @ w_qkvh (H, D, 3*hd)  ->  q, k, v  each (B, H, L, hd)
# Grid (B, M, H); no K axis, so x block (b, m, 0) is resident across the head
# sweep and the full f32 contraction is available for the fused epilogue.
# ----------------------------------------------------------------------------
def _qkv_rope_norm_kernel(x_ref, w_ref, cos_ref, sin_ref,
                          q_ref, k_ref, v_ref, *, hd, eps, temp_ratio):
    acc = jnp.dot(x_ref[0], w_ref[0], preferred_element_type=jnp.float32)
    cos = cos_ref[...]
    sin = sin_ref[...]
    q = _rms(_rope_full(acc[:, :hd], cos, sin, hd), eps)
    # Faithful to the module: the temperature ratio multiplies k BEFORE QKNorm.
    k = _rms(_rope_full(acc[:, hd:2 * hd], cos, sin, hd) * temp_ratio, eps)
    q_ref[0, 0] = q.astype(q_ref.dtype)
    k_ref[0, 0] = k.astype(k_ref.dtype)
    v_ref[0, 0] = acc[:, 2 * hd:].astype(v_ref.dtype)


def qkv_rope_norm(x, w_qkvh, cos_full, sin_full, *, hd, eps, temp_ratio,
                  out_dtype, block_m=256):
    B, L, D = x.shape
    H = w_qkvh.shape[0]
    tm = _fit(L, block_m)
    kernel = functools.partial(_qkv_rope_norm_kernel, hd=hd, eps=eps,
                               temp_ratio=temp_ratio)
    head_shape = jax.ShapeDtypeStruct((B, H, L, hd), out_dtype)
    head_spec = pl.BlockSpec((1, 1, tm, hd), lambda b, m, h: (b, h, m, 0))
    return pl.pallas_call(
        kernel,
        out_shape=(head_shape, head_shape, head_shape),
        grid=(B, L // tm, H),
        in_specs=[
            pl.BlockSpec((1, tm, D), lambda b, m, h: (b, m, 0)),       # x resident over h
            pl.BlockSpec((1, D, 3 * hd), lambda b, m, h: (h, 0, 0)),   # per-head weight
            pl.BlockSpec((tm, hd), lambda b, m, h: (m, 0)),            # rope cos
            pl.BlockSpec((tm, hd), lambda b, m, h: (m, 0)),            # rope sin
        ],
        out_specs=(head_spec, head_spec, head_spec),
        compiler_params=pltpu.CompilerParams(
            dimension_semantics=("parallel", "parallel", "arbitrary"),
            vmem_limit_bytes=_vmem_limit_bytes(),
        ),
    )(x, w_qkvh, cos_full, sin_full)


# ----------------------------------------------------------------------------
# Kernel 2: flash attention with VMEM-resident K/V per (b, h).
#   q, k, v (B, H, L, hd)  ->  o (B, L, D)   (heads written into lane slabs)
# ----------------------------------------------------------------------------
def _flash_kernel(q_ref, k_ref, v_ref, o_ref, *, tkv, scale, compute_dtype):
    tq = q_ref.shape[2]
    hd = q_ref.shape[3]
    n_kv = k_ref.shape[2] // tkv
    q = q_ref[0, 0]

    def body(i, carry):
        m_prev, l_prev, acc_prev = carry
        start = pl.multiple_of(i * tkv, tkv)
        k = k_ref[0, 0, pl.ds(start, tkv), :]
        v = v_ref[0, 0, pl.ds(start, tkv), :]
        s = lax.dot_general(q, k, (((1,), (1,)), ((), ())),
                            preferred_element_type=jnp.float32) * scale
        m_new = jnp.maximum(m_prev, jnp.max(s, axis=-1, keepdims=True))
        alpha = jnp.exp(m_prev - m_new)
        p = jnp.exp(s - m_new)
        l_new = alpha * l_prev + jnp.sum(p, axis=-1, keepdims=True)
        acc_new = alpha * acc_prev + jnp.dot(
            p.astype(compute_dtype), v, preferred_element_type=jnp.float32)
        return m_new, l_new, acc_new

    m0 = jnp.full((tq, 1), -jnp.inf, dtype=jnp.float32)
    l0 = jnp.zeros((tq, 1), dtype=jnp.float32)
    a0 = jnp.zeros((tq, hd), dtype=jnp.float32)
    _, l_fin, acc_fin = lax.fori_loop(0, n_kv, body, (m0, l0, a0))
    # EUP reciprocal of the (tq, 1) row sums instead of a full-tile divide.
    o_ref[0] = (acc_fin * pl.reciprocal(l_fin, approx=True)).astype(o_ref.dtype)


def flash_attention(q, k, v, *, out_dim, scale, compute_dtype, out_dtype,
                    block_q=256, block_kv=512):
    B, H, L, hd = q.shape
    tq = _fit(L, block_q)
    tkv = _fit(L, block_kv)
    kernel = functools.partial(_flash_kernel, tkv=tkv, scale=scale,
                               compute_dtype=compute_dtype)
    q_spec = pl.BlockSpec((1, 1, tq, hd), lambda b, h, qi: (b, h, qi, 0))
    # K/V block index does not depend on qi -> Pallas keeps them resident in
    # VMEM across the whole q sweep for a given (b, h).
    kv_spec = pl.BlockSpec((1, 1, L, hd), lambda b, h, qi: (b, h, 0, 0))
    return pl.pallas_call(
        kernel,
        out_shape=jax.ShapeDtypeStruct((B, L, out_dim), out_dtype),
        grid=(B, H, L // tq),
        in_specs=[q_spec, kv_spec, kv_spec],
        out_specs=pl.BlockSpec((1, tq, hd), lambda b, h, qi: (b, qi, h)),
        compiler_params=pltpu.CompilerParams(
            dimension_semantics=("parallel", "parallel", "parallel"),
            vmem_limit_bytes=_vmem_limit_bytes(),
        ),
    )(q, k, v)


# ----------------------------------------------------------------------------
# Kernel 3: output projection, plain (B, L, D) @ (D, D) with deep K tiles.
# ----------------------------------------------------------------------------
def _proj_kernel(a_ref, w_ref, o_ref, acc_ref):
    kk = pl.program_id(3)

    @pl.when(kk == 0)
    def _():
        acc_ref[...] = jnp.zeros(acc_ref.shape, acc_ref.dtype)

    acc_ref[...] += jnp.dot(a_ref[0], w_ref[...],
                            preferred_element_type=jnp.float32)

    @pl.when(kk == pl.num_programs(3) - 1)
    def _():
        o_ref[0] = acc_ref[...].astype(o_ref.dtype)


def out_projection(a, w, *, out_dtype, block_m=256, block_n=512, block_k=512):
    B, L, D = a.shape
    Dk, Dn = w.shape
    assert Dk == D
    tm = _fit(L, block_m)
    tn = _fit(Dn, block_n)
    tk = _fit(Dk, block_k)
    return pl.pallas_call(
        _proj_kernel,
        out_shape=jax.ShapeDtypeStruct((B, L, Dn), out_dtype),
        grid=(B, L // tm, Dn // tn, Dk // tk),
        in_specs=[
            pl.BlockSpec((1, tm, tk), lambda b, m, n, k: (b, m, k)),
            pl.BlockSpec((tk, tn), lambda b, m, n, k: (k, n)),
        ],
        out_specs=pl.BlockSpec((1, tm, tn), lambda b, m, n, k: (b, m, n)),
        scratch_shapes=[pltpu.VMEM((tm, tn), jnp.float32)],
        compiler_params=pltpu.CompilerParams(
            dimension_semantics=("parallel", "parallel", "parallel", "arbitrary"),
            vmem_limit_bytes=_vmem_limit_bytes(),
        ),
    )(a, w)


# ----------------------------------------------------------------------------
# Full Attention.forward (self-attention path)
# ----------------------------------------------------------------------------
def attention_forward(x, w_qkv, w_proj, rope_cos, rope_sin, *, num_heads,
                      dynamic_softmax_temperature=False, eps=1e-6,
                      compute_dtype=jnp.bfloat16,
                      block_m=256, block_q=256, block_kv=512,
                      block_pm=256, block_pn=512, block_pk=512):
    """Returns (out, v): out (B, L, D), v (B, H, L, head_dim), like the module."""
    B, L, D = x.shape
    H = num_heads
    hd = D // H

    # One-time parameter re-layouts and dtype casts (no activation HBM traffic):
    #   w_qkv (D, 3D) with columns ordered (k, h, d) -> (H, D, 3*hd) per head
    #   w_proj stays (D, D)
    w_qkvh = (w_qkv.reshape(D, 3, H, hd)
                   .transpose(2, 0, 1, 3)
                   .reshape(H, D, 3 * hd)).astype(compute_dtype)
    w_projc = w_proj.astype(compute_dtype)
    x_c = x.astype(compute_dtype)

    # Full-width, lane-aligned rope tables: y = t*cos_full + roll(t, hd/2)*sin_signed
    cos_full = jnp.concatenate([rope_cos, rope_cos], axis=-1).astype(jnp.float32)
    sin_full = jnp.concatenate([rope_sin, -rope_sin], axis=-1).astype(jnp.float32)

    temp_ratio = 1.0
    if dynamic_softmax_temperature:
        temp_ratio = math.sqrt(math.log(L) / math.log(1040.0))

    q, k, v = qkv_rope_norm(x_c, w_qkvh, cos_full, sin_full, hd=hd, eps=eps,
                            temp_ratio=temp_ratio, out_dtype=compute_dtype,
                            block_m=block_m)                        # 3x (B, H, L, hd)
    o = flash_attention(q, k, v, out_dim=D, scale=hd ** -0.5,
                        compute_dtype=compute_dtype, out_dtype=compute_dtype,
                        block_q=block_q, block_kv=block_kv)          # (B, L, D)
    out = out_projection(o, w_projc, out_dtype=x.dtype,
                         block_m=block_pm, block_n=block_pn,
                         block_k=block_pk)                           # (B, L, D)
    return out, v


# ----------------------------------------------------------------------------
# Pure-JAX reference (mirrors the PyTorch forward) for correctness checks
# ----------------------------------------------------------------------------
def reference_forward(x, w_qkv, w_proj, cos, sin, *, num_heads, eps=1e-6,
                      dynamic_softmax_temperature=False):
    B, L, D = x.shape
    H = num_heads
    hd = D // H
    qkv = (x.reshape(B * L, D) @ w_qkv).reshape(B, L, 3, H, hd).transpose(2, 0, 3, 1, 4)
    q, k, v = qkv[0], qkv[1], qkv[2]
    d2 = hd // 2

    def rope(t):
        t1, t2 = t[..., :d2], t[..., d2:]
        return jnp.concatenate([t1 * cos + t2 * sin, -t1 * sin + t2 * cos], -1)

    def rms(t):
        return t * jax.lax.rsqrt(jnp.mean(t * t, -1, keepdims=True) + eps)

    q, k = rope(q), rope(k)
    if dynamic_softmax_temperature:
        k = k * math.sqrt(math.log(L) / math.log(1040.0))   # same order as module
    q, k = rms(q), rms(k)
    s = jnp.einsum("bhld,bhmd->bhlm", q, k) * (hd ** -0.5)
    p = jax.nn.softmax(s, axis=-1)
    o = jnp.einsum("bhlm,bhmd->bhld", p, v)
    o = o.transpose(0, 2, 1, 3).reshape(B, L, D)
    return o @ w_proj, v


# ----------------------------------------------------------------------------
if __name__ == "__main__":
    B, L, D, H = 2, 16, 256, 2          # batch, seq, dim, heads -> head_dim = 128
    hd = D // H

    key = jax.random.PRNGKey(0)
    kx, kq, kp = jax.random.split(key, 3)

    x = jax.random.normal(kx, (B, L, D), dtype=jnp.float32)
    # deterministic synthetic parameters (stored already-transposed: y = x @ W)
    w_qkv = 0.02 * jax.random.normal(kq, (D, 3 * D), dtype=jnp.float32)
    w_proj = 0.02 * jax.random.normal(kp, (D, D), dtype=jnp.float32)

    # rope tables, shape (L, head_dim // 2)
    pos = jnp.arange(L, dtype=jnp.float32)[:, None]
    inv_freq = 1.0 / (10000.0 ** (jnp.arange(hd // 2, dtype=jnp.float32) / (hd // 2)))
    angles = pos * inv_freq[None, :]
    rope_cos = jnp.cos(angles)
    rope_sin = jnp.sin(angles)

    # Run 1: f32 MXU operands, small blocks so every multi-step path is exercised
    # (flash in-kernel KV loop, projection K-reduction grid axis, head sweep).
    out1, v1 = attention_forward(
        x, w_qkv, w_proj, rope_cos, rope_sin, num_heads=H,
        compute_dtype=jnp.float32,
        block_m=8, block_q=8, block_kv=8,
        block_pm=8, block_pn=128, block_pk=128)
    out1 = jax.block_until_ready(out1)
    v1 = jax.block_until_ready(v1)
    ref1, refv1 = reference_forward(x, w_qkv, w_proj, rope_cos, rope_sin, num_heads=H)
    assert out1.shape == (B, L, D) and v1.shape == (B, H, L, hd)
    np.testing.assert_allclose(np.asarray(out1), np.asarray(ref1), atol=2e-2, rtol=2e-2)
    np.testing.assert_allclose(np.asarray(v1), np.asarray(refv1), atol=1e-2, rtol=1e-2)

    # Run 2: production config -- bf16 operands/intermediates (f32 accumulate and
    # f32 element-wise math) + dynamic softmax temperature, default (big) tiles.
    out2, v2 = attention_forward(
        x, w_qkv, w_proj, rope_cos, rope_sin, num_heads=H,
        dynamic_softmax_temperature=True, compute_dtype=jnp.bfloat16)
    out2 = jax.block_until_ready(out2)
    v2 = jax.block_until_ready(v2)
    ref2, refv2 = reference_forward(x, w_qkv, w_proj, rope_cos, rope_sin,
                                    num_heads=H, dynamic_softmax_temperature=True)
    np.testing.assert_allclose(np.asarray(out2), np.asarray(ref2), atol=3e-2, rtol=3e-2)
    np.testing.assert_allclose(np.asarray(v2.astype(jnp.float32)),
                               np.asarray(refv2), atol=3e-2, rtol=3e-2)

    print("KERNEL_OK")
</pallas_src>

<mosaic_0001>
module attributes {stable_mosaic.version = 11 : i64} {
  func.func @_qkv_rope_norm_kernel(%arg0: i32, %arg1: i32, %arg2: i32, %arg3: memref<1x8x256xf32, #tpu.memory_space<vmem>>, %arg4: memref<1x256x384xf32, #tpu.memory_space<vmem>>, %arg5: memref<8x128xf32, #tpu.memory_space<vmem>>, %arg6: memref<8x128xf32, #tpu.memory_space<vmem>>, %arg7: memref<1x1x8x128xf32, #tpu.memory_space<vmem>>, %arg8: memref<1x1x8x128xf32, #tpu.memory_space<vmem>>, %arg9: memref<1x1x8x128xf32, #tpu.memory_space<vmem>>) attributes {dimension_semantics = [#tpu.dimension_semantics<parallel>, #tpu.dimension_semantics<parallel>, #tpu.dimension_semantics<arbitrary>], iteration_bounds = array<i64: 2, 2, 2>, scalar_prefetch = 0 : i64, scratch_operands = 0 : i64, tpu.core_type = #tpu.core_type<tc>, window_params = [{transform_indices = @transform_0, window_bounds = array<i64: 1, 8, 256>}, {transform_indices = @transform_1, window_bounds = array<i64: 1, 256, 384>}, {transform_indices = @transform_2, window_bounds = array<i64: 8, 128>}, {transform_indices = @transform_3, window_bounds = array<i64: 8, 128>}, {transform_indices = @transform_4, window_bounds = array<i64: 1, 1, 8, 128>}, {transform_indices = @transform_5, window_bounds = array<i64: 1, 1, 8, 128>}, {transform_indices = @transform_6, window_bounds = array<i64: 1, 1, 8, 128>}]} {
    %c0 = arith.constant 0 : index
    %c0_0 = arith.constant 0 : index
    %c0_1 = arith.constant 0 : index
    %0 = vector.load %arg3[%c0, %c0_0, %c0_1] : memref<1x8x256xf32, #tpu.memory_space<vmem>>, vector<1x8x256xf32>
    %1 = vector.shape_cast %0 : vector<1x8x256xf32> to vector<8x256xf32>
    %c0_2 = arith.constant 0 : index
    %c0_3 = arith.constant 0 : index
    %c0_4 = arith.constant 0 : index
    %2 = vector.load %arg4[%c0_2, %c0_3, %c0_4] : memref<1x256x384xf32, #tpu.memory_space<vmem>>, vector<1x256x384xf32>
    %3 = vector.shape_cast %2 : vector<1x256x384xf32> to vector<256x384xf32>
    %cst = arith.constant dense<0.000000e+00> : vector<8x384xf32>
    %4 = tpu.matmul %1, %3, %cst {dimension_numbers = #tpu.dot_dimension_numbers<[1], [0], [0], [1], [0, 0, 1, 1], [], []>} : vector<8x256xf32>, vector<256x384xf32>, vector<8x384xf32> -> vector<8x384xf32>
    %c0_5 = arith.constant 0 : index
    %c0_6 = arith.constant 0 : index
    %5 = vector.load %arg5[%c0_5, %c0_6] : memref<8x128xf32, #tpu.memory_space<vmem>>, vector<8x128xf32>
    %c0_7 = arith.constant 0 : index
    %c0_8 = arith.constant 0 : index
    %6 = vector.load %arg6[%c0_7, %c0_8] : memref<8x128xf32, #tpu.memory_space<vmem>>, vector<8x128xf32>
    %7 = vector.extract_strided_slice %4 {offsets = [0, 0], sizes = [8, 128], strides = [1, 1]} : vector<8x384xf32> to vector<8x128xf32>
    %8 = arith.mulf %7, %5 : vector<8x128xf32>
    %c64_i32 = arith.constant 64 : i32
    %9 = tpu.dynamic_rotate %7 by %c64_i32 dim 1 : vector<8x128xf32>, i32 -> vector<8x128xf32>
    %10 = arith.mulf %9, %6 : vector<8x128xf32>
    %11 = arith.addf %8, %10 : vector<8x128xf32>
    %12 = arith.mulf %11, %11 : vector<8x128xf32>
    %cst_9 = arith.constant dense<0.000000e+00> : vector<8xf32>
    %13 = vector.multi_reduction <add>, %12, %cst_9 [1] : vector<8x128xf32> to vector<8xf32>
    %14 = vector.shape_cast %13 : vector<8xf32> to vector<8x1xf32>
    %cst_10 = arith.constant 1.280000e+02 : f32
    %15 = vector.broadcast %cst_10 : f32 to vector<8x1xf32>
    %16 = arith.divf %14, %15 : vector<8x1xf32>
    %cst_11 = arith.constant 9.99999997E-7 : f32
    %17 = vector.broadcast %cst_11 : f32 to vector<8x1xf32>
    %18 = arith.addf %16, %17 : vector<8x1xf32>
    %19 = math.rsqrt %18 : vector<8x1xf32>
    %20 = vector.broadcast %19 : vector<8x1xf32> to vector<8x128xf32>
    %21 = arith.mulf %11, %20 : vector<8x128xf32>
    %22 = vector.extract_strided_slice %4 {offsets = [0, 128], sizes = [8, 128], strides = [1, 1]} : vector<8x384xf32> to vector<8x128xf32>
    %23 = arith.mulf %22, %5 : vector<8x128xf32>
    %c64_i32_12 = arith.constant 64 : i32
    %24 = tpu.dynamic_rotate %22 by %c64_i32_12 dim 1 : vector<8x128xf32>, i32 -> vector<8x128xf32>
    %25 = arith.mulf %24, %6 : vector<8x128xf32>
    %26 = arith.addf %23, %25 : vector<8x128xf32>
    %cst_13 = arith.constant 1.000000e+00 : f32
    %27 = vector.broadcast %cst_13 : f32 to vector<8x128xf32>
    %28 = arith.mulf %26, %27 : vector<8x128xf32>
    %29 = arith.mulf %28, %28 : vector<8x128xf32>
    %cst_14 = arith.constant dense<0.000000e+00> : vector<8xf32>
    %30 = vector.multi_reduction <add>, %29, %cst_14 [1] : vector<8x128xf32> to vector<8xf32>
    %31 = vector.shape_cast %30 : vector<8xf32> to vector<8x1xf32>
    %cst_15 = arith.constant 1.280000e+02 : f32
    %32 = vector.broadcast %cst_15 : f32 to vector<8x1xf32>
    %33 = arith.divf %31, %32 : vector<8x1xf32>
    %cst_16 = arith.constant 9.99999997E-7 : f32
    %34 = vector.broadcast %cst_16 : f32 to vector<8x1xf32>
    %35 = arith.addf %33, %34 : vector<8x1xf32>
    %36 = math.rsqrt %35 : vector<8x1xf32>
    %37 = vector.broadcast %36 : vector<8x1xf32> to vector<8x128xf32>
    %38 = arith.mulf %28, %37 : vector<8x128xf32>
    %c0_17 = arith.constant 0 : index
    %c0_18 = arith.constant 0 : index
    %c0_19 = arith.constant 0 : index
    %c0_20 = arith.constant 0 : index
    %39 = vector.load %arg7[%c0_17, %c0_18, %c0_19, %c0_20] : memref<1x1x8x128xf32, #tpu.memory_space<vmem>>, vector<1x1x8x128xf32>
    %40 = vector.shape_cast %39 : vector<1x1x8x128xf32> to vector<8x128xf32>
    %41 = vector.shape_cast %21 : vector<8x128xf32> to vector<1x1x8x128xf32>
    tpu.vector_store %arg7[%c0_17, %c0_18, %c0_19, %c0_20], %41 {strides = array<i32>} : memref<1x1x8x128xf32, #tpu.memory_space<vmem>>, vector<1x1x8x128xf32>,
    %c0_21 = arith.constant 0 : index
    %c0_22 = arith.constant 0 : index
    %c0_23 = arith.constant 0 : index
    %c0_24 = arith.constant 0 : index
    %42 = vector.load %arg8[%c0_21, %c0_22, %c0_23, %c0_24] : memref<1x1x8x128xf32, #tpu.memory_space<vmem>>, vector<1x1x8x128xf32>
    %43 = vector.shape_cast %42 : vector<1x1x8x128xf32> to vector<8x128xf32>
    %44 = vector.shape_cast %38 : vector<8x128xf32> to vector<1x1x8x128xf32>
    tpu.vector_store %arg8[%c0_21, %c0_22, %c0_23, %c0_24], %44 {strides = array<i32>} : memref<1x1x8x128xf32, #tpu.memory_space<vmem>>, vector<1x1x8x128xf32>,
    %45 = vector.extract_strided_slice %4 {offsets = [0, 256], sizes = [8, 128], strides = [1, 1]} : vector<8x384xf32> to vector<8x128xf32>
    %c0_25 = arith.constant 0 : index
    %c0_26 = arith.constant 0 : index
    %c0_27 = arith.constant 0 : index
    %c0_28 = arith.constant 0 : index
    %46 = vector.load %arg9[%c0_25, %c0_26, %c0_27, %c0_28] : memref<1x1x8x128xf32, #tpu.memory_space<vmem>>, vector<1x1x8x128xf32>
    %47 = vector.shape_cast %46 : vector<1x1x8x128xf32> to vector<8x128xf32>
    %48 = vector.shape_cast %45 : vector<8x128xf32> to vector<1x1x8x128xf32>
    tpu.vector_store %arg9[%c0_25, %c0_26, %c0_27, %c0_28], %48 {strides = array<i32>} : memref<1x1x8x128xf32, #tpu.memory_space<vmem>>, vector<1x1x8x128xf32>,
    return
  }
  func.func @transform_0(%arg0: i32, %arg1: i32, %arg2: i32) -> (i32, i32, i32) {
    %c0_i32 = arith.constant 0 : i32
    %c0_i32_0 = arith.constant 0 : i32
    return %arg0, %arg1, %c0_i32 : i32, i32, i32
  }
  func.func @transform_1(%arg0: i32, %arg1: i32, %arg2: i32) -> (i32, i32, i32) {
    %c0_i32 = arith.constant 0 : i32
    %c0_i32_0 = arith.constant 0 : i32
    %c0_i32_1 = arith.constant 0 : i32
    return %arg2, %c0_i32, %c0_i32_0 : i32, i32, i32
  }
  func.func @transform_2(%arg0: i32, %arg1: i32, %arg2: i32) -> (i32, i32) {
    %c0_i32 = arith.constant 0 : i32
    %c0_i32_0 = arith.constant 0 : i32
    return %arg1, %c0_i32 : i32, i32
  }
  func.func @transform_3(%arg0: i32, %arg1: i32, %arg2: i32) -> (i32, i32) {
    %c0_i32 = arith.constant 0 : i32
    %c0_i32_0 = arith.constant 0 : i32
    return %arg1, %c0_i32 : i32, i32
  }
  func.func @transform_4(%arg0: i32, %arg1: i32, %arg2: i32) -> (i32, i32, i32, i32) {
    %c0_i32 = arith.constant 0 : i32
    %c0_i32_0 = arith.constant 0 : i32
    return %arg0, %arg2, %arg1, %c0_i32 : i32, i32, i32, i32
  }
  func.func @transform_5(%arg0: i32, %arg1: i32, %arg2: i32) -> (i32, i32, i32, i32) {
    %c0_i32 = arith.constant 0 : i32
    %c0_i32_0 = arith.constant 0 : i32
    return %arg0, %arg2, %arg1, %c0_i32 : i32, i32, i32, i32
  }
  func.func @transform_6(%arg0: i32, %arg1: i32, %arg2: i32) -> (i32, i32, i32, i32) {
    %c0_i32 = arith.constant 0 : i32
    %c0_i32_0 = arith.constant 0 : i32
    return %arg0, %arg2, %arg1, %c0_i32 : i32, i32, i32, i32
  }
}

</mosaic_0001>

<bundles_post_ra>
// kernel: tpu_custom_call.1
= control target key start
LH: loop header
LB: loop body
LE: loop exit
PB: predicated region body
PF: predicated region fallthrough
CT: control target
= control target key end

     0   :  { %s2481_s0 = inlined_call_operand.hbm [shape: f32[2,16,256], index: 0, kind: input, shape index: {}]   ;;  %s2482_s1 = inlined_call_operand.hbm [shape: f32[2,256,384], index: 1, kind: input, shape index: {}]   ;;  %s2483_s2 = inlined_call_operand.hbm [shape: f32[16,128], index: 2, kind: input, shape index: {}]   ;;  %s2484_s3 = inlined_call_operand.hbm [shape: f32[16,128], index: 3, kind: input, shape index: {}]   ;;  %s2485_s4 = inlined_call_operand.hbm [shape: f32[2,2,16,128], index: 4, kind: output, shape index: {0}]   ;;  %s2486_s5 = inlined_call_operand.hbm [shape: f32[2,2,16,128], index: 5, kind: output, shape index: {1}]   ;;  %s2487_s6 = inlined_call_operand.hbm [shape: f32[2,2,16,128], index: 6, kind: output, shape index: {2}]  }
   0x1   :  { %2523 = sst [smem:[#allocation38_spill]] %s2481_s0 }
   0x2   :  { %2524 = sst [smem:[#allocation39_spill]] %s2482_s1 }
   0x3   :  { %2525 = sst [smem:[#allocation40_spill]] %s2483_s2 }
   0x4   :  { %2526 = sst [smem:[#allocation41_spill]] %s2484_s3 }
   0x5   :  { %2527 = sst [smem:[#allocation42_spill]] %s2485_s4 }
   0x6   :  { %2528 = sst [smem:[#allocation43_spill]] %s2486_s5 }
   0x7   :  { %2529 = sst [smem:[#allocation44_spill]] %s2487_s6 }
   0x8   :  { %12 = vsyncpa [#allocation3], 0 }
   0x9   :  { %14 = vsyncpa [#allocation3 + $0x1], 0 }
   0xa   :  { %15 = vsyncpa [#allocation6], 0 }
   0xb   :  { %17 = vsyncpa [#allocation6 + $0x1], 0 }
   0xc   :  { %18 = vsyncpa [#allocation9], 0 }
   0xd   :  { %20 = vsyncpa [#allocation9 + $0x1], 0 }
   0xe   :  { %21 = vsyncpa [#allocation4], 0 }
   0xf   :  { %23 = vsyncpa [#allocation4 + $0x1], 0 }
  0x10   :  { %24 = vsyncpa [#allocation12], 0 }
  0x11   :  { %26 = vsyncpa [#allocation12 + $0x1], 0  ;;  %s1783_s21 = smov 0   ;;  %s1785_s22 = smov 0  }
  0x12   :  { %s1787_s23 = smov 0   ;;  %s1789_s24 = smov 0  }
  0x13   :  { %s1791_s25 = smov 0   ;;  %s1793_s26 = smov 0  }
  0x14   :  { %s1795_s27 = smov 0   ;;  %s1797_s28 = smov 0  }
  0x15   :  { %s1799_s29 = smov 0   ;;  %s1801_s30 = smov 0  }
  0x16   :  { %s1803_s7 = smov 0   ;;  %s1805_s8 = smov 0  }
  0x17   :  { %s1807_s9 = smov 0   ;;  %s1809_s10 = smov 0  }
  0x18   :  { %s1811_s11 = smov 0   ;;  %s1813_s12 = smov 0  }
  0x19   :  { %s1815_s13 = smov 0   ;;  %s1817_s14 = smov 0  }
  0x1a   :  { %s1819_s15 = smov 0  }
  0x1b LB: > { %2530 = sst [smem:[#allocation20_spill]] %s1692_s28  ;;  %s44_s16 = sadd.s32 1, %s1724_s12  ;;  %s1736_s15 = sphi %s1819_s15, %s32_s15   ;;  %s1732_s14 = sphi %s1817_s14, %s2610_s14   ;;  %s1728_s13 = sphi %s1815_s13, %s2608_s13   ;;  %s1724_s12 = sphi %s1813_s12, %s2606_s12   ;;  %s1720_s11 = sphi %s1811_s11, %s2605_s11   ;;  %s1716_s10 = sphi %s1809_s10, %s2604_s10   ;;  %s1712_s9 = sphi %s1807_s9, %s2603_s9   ;;  %s1708_s8 = sphi %s1805_s8, %s2616_s8   ;;  %s1704_s7 = sphi %s1803_s7, %s2601_s7   ;;  %s1700_s30 = sphi %s1801_s30, %s2600_s30   ;;  %s1696_s29 = sphi %s1799_s29, %s2599_s29   ;;  %s1692_s28 = sphi %s1797_s28, %s2598_s28   ;;  %s1688_s27 = sphi %s1795_s27, %s2597_s27   ;;  %s1684_s26 = sphi %s1793_s26, %s2615_s26   ;;  %s1680_s25 = sphi %s1791_s25, %s2614_s25   ;;  %s1676_s24 = sphi %s1789_s24, %s2612_s24   ;;  %s1672_s23 = sphi %s1787_s23, %s2611_s23   ;;  %s1668_s22 = sphi %s1785_s22, %s2609_s22   ;;  %s1664_s21 = sphi %s1783_s21, %s2607_s21  }
  0x1c   : > { %2531 = sst [smem:[#allocation21_spill]] %s1696_s29  ;;  %p2497_p0 = scmp.eq.s32.totalorder %s1736_s15, 0 }
  0x1d   : > { %2532 = sst [smem:[#allocation22_spill]] %s1704_s7  ;;  %p1880_p1 = scmp.ge.s32.totalorder %s44_s16, 2 }
  0x1e   : > { %2533 = sst [smem:[#allocation23_spill]] %s1708_s8  ;;  %s86_s18 = sadd.s32 1, %s1696_s29 }
  0x1f   : > { %2534 = sst [smem:[#allocation24_spill]] %s1712_s9  ;;  %p93_p2 = scmp.ne.s32.totalorder %s1696_s29, %s1692_s28 }
  0x20   : > { %2535 = sst [smem:[#allocation25_spill]] %s1716_s10  ;;  %s2618_s16 = smov (%p1880_p1, %s44_s16), 0 }
  0x21   : > { %2536 = sst [smem:[#allocation26_spill]] %s1720_s11  ;;  %p95_p4 = por %p93_p2, %p2497_p0 }
  0x22   : > { %2537 = sst [smem:[#allocation27_spill]] %s1724_s12  ;;  %s1897_s19 = ssub.s32 %s1724_s12, %s2618_s16 }
  0x23   : > { %2538 = sst [smem:[#allocation28_spill]] %s1728_s13  ;;  %p2496_p5 = scmp.lt.s32.totalorder %s1736_s15, 8 }
  0x24   : > { %2539 = sst [smem:[#allocation29_spill]] %s1732_s14  ;;  %p84_p6 = scmp.eq.s32.totalorder %s1897_s19, 0 }
  0x25   : > { %2541 = sst [smem:[#allocation30_spill]] %s2618_s16  ;;  %s286_s20 = sand.u32 1, %s1736_s15  }
  0x26   : > { %s288_s4 = sand.u32 1, %s1696_s29   ;;  %p1908_p7 = pnand %p2496_p5, %p95_p4 }
  0x27   : > { %s1904_s6 = scalar_select %p84_p6, %s1696_s29, %s86_s18  }
  0x28   : > { %s1157_s5 = smul.u32 768, %s288_s4  ;;  %s2544_s1 = sld [smem:[#allocation39_spill]] }
  0x29   : > { %2542 = sst [smem:[#allocation31_spill]] %s1904_s6  ;;  %s1158_s10 = smul.u32 12288, %s1724_s12 }
  0x2a   : > { %s290_s18 = scalar_lea.vmem [#allocation5], %s1157_s5  ;;  %s1920_s4 = scalar_lea.sflag [#allocation6], %s286_s20 }
  0x2b   : > { %s297_s6 = sshll.u32 %s290_s18, 4  ;;  %p1360_p9 = pneg %p1908_p7  ;;  %s1918_s6 = int_to_ptr.vmem [resolvable:$true] %s297_s6 }
  0x2e   : > { %s1916_s16 = scalar_lea.hbm %s2544_s1, %s1158_s10  ;;  %s1363_s10 = scalar_lea.hbm %s2544_s1, 24576 }
  0x2f   : > { %s1358_s29 = scalar_lea.hbm %s1916_s16, 12288  ;;  %p1364_p12 = scmp.lt.u32.totalorder %s1916_s16, %s2544_s1 }
  0x30   : > { %p1359_p8 = scmp.ne.s32.totalorder %s1916_s16, %s1358_s29  ;;  %p1365_p13 = scmp.lt.u32.totalorder %s1363_s10, %s1358_s29 }
  0x31   : > { %p1367_p4 = scmp.lt.u32.totalorder %s1358_s29, %s1916_s16 }
  0x32   : > { %p1361_p10 = pnand %p1360_p9, %p1359_p8  ;;  %p1366_p2 = por %p1365_p13, %p1364_p12 }
  0x34   : > { %p1362_p11 = pneg %p1361_p10  ;;  %p1368_p6 = por %p1367_p4, %p1366_p2 }
  0x36   : > { %p1369_p5 = pnand %p1368_p6, %p1362_p11 }
  0x38   : > { %1372 = shalt.err (!%p1369_p5)
}
  0x39   : > { %s1373_s5 = scalar_lea.vmem %s1918_s6, 12288  ;;  %s1738_s20 = smov [#allocation5]  }
  0x3a   : > { %p1374_p8 = scmp.ne.s32.totalorder %s1918_s6, %s1373_s5  ;;  %s1378_s18 = sshll.u32 %s1738_s20, 4  ;;  %s1379_s18 = int_to_ptr.vmem [resolvable:$false] %s1378_s18 }
  0x3b   : > { %s1380_s2 = scalar_lea.vmem %s1379_s18, 24576  ;;  %p1381_p0 = scmp.lt.s32.totalorder %s1918_s6, %s1379_s18 }
  0x3c   : > { %p1376_p10 = pnand %p1374_p8, %p1360_p9  ;;  %p1382_p12 = scmp.lt.s32.totalorder %s1380_s2, %s1373_s5 }
  0x3e   : > { %p1377_p3 = pneg %p1376_p10  ;;  %p1383_p13 = por %p1382_p12, %p1381_p0 }
  0x40   : > { %p1384_p2 = pnand %p1383_p13, %p1377_p3 }
  0x42   : > { %1387 = shalt.err (!%p1384_p2)
}
  0x43   : > { %s1739_s29 = smov 384   ;;  %s1740_s12 = smov 24  }
  0x44   : > { %1180 = dma.hbm_to_vmem [thread:$0]  (!%p1908_p7), %s1916_s16, 12288, %s1918_s6, %s1920_s4, %s1739_s29, %s1739_s29, %s1740_s12  }
  0x45   : > { %p1005_p0 = scmp.ge.s32.totalorder %s1736_s15, 1  ;;  %p341_p3 = scmp.lt.s32.totalorder %s1736_s15, 9 }
  0x46   : > { %s1955_s9 = sadd.s32 4294967295, %s1736_s15   ;;  %s47_s5 = sadd.s32 1, %s1728_s13 }
  0x47   : > { %p1950_p5 = pnand %p1005_p0, %p341_p3  ;;  %s2620_s5 = smov (!%p1880_p1, %s47_s5), %s1728_s13 }
  0x48   : > { %s51_s6 = sadd.s32 1, %s1732_s14  ;;  %s60_s11 = sadd.s32 1, %s1708_s8 }
  0x49   : > { %s2545_s3 = scalar_select %p1950_p5, 1, 0 }
  0x4a   : > { %p49_p7 = scmp.ge.s32.totalorder %s2620_s5, 2  ;;  %p67_p9 = scmp.ne.s32.totalorder %s1708_s8, %s1704_s7 }
  0x4b   : > { %p73_p11 = scmp.ne.s32.totalorder %s1704_s7, %s1700_s30  ;;  %p2508_p4 = scmp.eq.s32.totalorder %s1955_s9, 0 }
  0x4c   : > { %s2622_s5 = smov (%p49_p7, %s2620_s5), 0  ;;  %s2624_s6 = smov (!%p49_p7, %s51_s6), %s1732_s14 }
  0x4d   : > { %2546 = sst [smem:[#allocation32_spill]] %s2622_s5  ;;  %s1974_s16 = ssub.s32 %s1728_s13, %s2622_s5 }
  0x4e   : > { %p2547_p6 = scmp.eq.s32.totalorder %s1736_s15, 0  ;;  %p53_p8 = scmp.ge.s32.totalorder %s2624_s6, 2 }
  0x4f   : > { %p1984_p10 = por %p2508_p4, %p73_p11  ;;  %p2551_p12 = scmp.ne.s32.totalorder %s1692_s28, %s1688_s27 }
  0x50   : > { %p1978_p1 = por %p2547_p6, %p67_p9  ;;  %s2626_s6 = smov (%p53_p8, %s2624_s6), 0 }
  0x51   : > { %s2549_s30 = scalar_select %p1984_p10, 1, 0 }
  0x52   : > { %p1993_p13 = por %p2551_p12, %p2508_p4  ;;  %2554 = sst [smem:[#allocation35_spill]] %s2626_s6 }
  0x53   : > { %2550 = sst [smem:[#allocation33_spill]] %s2549_s30  ;;  %s168_s18 = sadd.s32 1, %s1672_s23 }
  0x54   : > { %s2552_s20 = scalar_select %p1993_p13, 1, 0 }
  0x55   : > { %p178_p0 = scmp.ne.s32.totalorder %s1672_s23, %s1668_s22  ;;  %s55_s2 = ssub.s32 %s1732_s14, %s2626_s6 }
  0x56   : > { %2553 = sst [smem:[#allocation34_spill]] %s2552_s20  ;;  %p179_p3 = scmp.eq.s32.totalorder %s1955_s9, 7 }
  0x57   : > { %s57_s29 = sor.u32 %s1974_s16, %s55_s2  ;;  %s163_s27 = sor.u32 %s1897_s19, %s55_s2 }
  0x58   : > { %p58_p7 = scmp.eq.s32.totalorder %s57_s29, 0  ;;  %s165_s12 = sor.u32 %s163_s27, %s1974_s16 }
  0x59   : > { %p166_p9 = scmp.eq.s32.totalorder %s165_s12, 0  ;;  %p2009_p11 = por %p179_p3, %p178_p0 }
  0x5a   : > { %s2014_s1 = scalar_select %p58_p7, %s1708_s8, %s60_s11  }
  0x5b   : > { %s2555_s10 = scalar_select %p2009_p11, 1, 0 }
  0x5c   : > { %2557 = sst [smem:[#allocation37_spill]] %s2014_s1  ;;  %p184_p6 = scmp.ne.s32.totalorder %s1668_s22, %s1664_s21 }
  0x5d   : > { %2556 = sst [smem:[#allocation36_spill]] %s2555_s10  ;;  %s2558_s20 = sadd.s32 4294967294, %s1736_s15  }
  0x5e   : > { %s2017_s5 = scalar_select %p166_p9, %s1672_s23, %s168_s18  }
  0x5f   : > { %p185_p8 = scmp.eq.s32.totalorder %s2558_s20, 7  ;;  %s265_s6 = sand.u32 1, %s1708_s8  }
  0x60   : > { %s997_s28 = sshll.u32 %s1728_s13, 1  ;;  %s996_s2 = sshll.u32 %s265_s6, 4 }
  0x61   : > { %p2025_p12 = por %p185_p8, %p184_p6  ;;  %s998_s29 = sshll.u32 %s1732_s14, 2 }
  0x62   : > { %s275_s27 = sadd.s32 %s998_s29, %s997_s28  ;;  %s269_s10 = scalar_lea.vmem [#allocation2], %s996_s2 }
  0x63   : > { %s2559_s19 = scalar_select %p2025_p12, 1, 0 }
  0x64   : > { %s999_s12 = sshll.u32 %s275_s27, 7  ;;  %s279_s30 = sshll.u32 %s269_s10, 4  ;;  %s2035_s30 = int_to_ptr.vmem [resolvable:$true] %s279_s30 }
  0x65   : > { %s2560_s0 = sld [smem:[#allocation38_spill]]  ;;  %p2561_p0 = scmp.lt.s32.totalorder %s1736_s15, 8 }
  0x66   : > { %s266_s28 = scalar_lea.sflag [#allocation3], %s265_s6 }
  0x67   : > { %p2041_p3 = pnand %p2561_p0, %p1978_p1 }
  0x69   : > { %p1390_p9 = pneg %p2041_p3 }
  0x6b   : > { %s2033_s18 = scalar_lea.hbm %s2560_s0, %s999_s12  ;;  %s1393_s17 = scalar_lea.hbm %s2560_s0, 1024 }
  0x6c   : > { %s1388_s10 = scalar_lea.hbm %s2033_s18, 256  ;;  %p1394_p1 = scmp.lt.u32.totalorder %s2033_s18, %s2560_s0 }
  0x6d   : > { %p1389_p7 = scmp.ne.s32.totalorder %s2033_s18, %s1388_s10  ;;  %p1395_p0 = scmp.lt.u32.totalorder %s1393_s17, %s1388_s10 }
  0x6e   : > { %p1397_p2 = scmp.lt.u32.totalorder %s1388_s10, %s2033_s18 }
  0x6f   : > { %p1391_p6 = pnand %p1390_p9, %p1389_p7  ;;  %p1396_p4 = por %p1395_p0, %p1394_p1 }
  0x71   : > { %p1392_p8 = pneg %p1391_p6  ;;  %p1398_p12 = por %p1397_p2, %p1396_p4 }
  0x73   : > { %p1399_p11 = pnand %p1398_p12, %p1392_p8 }
  0x75   : > { %1402 = shalt.err (!%p1399_p11)
}
  0x76   : > { %s1403_s6 = scalar_lea.vmem %s2035_s30, 256  ;;  %s1741_s12 = smov [#allocation2]  }
  0x77   : > { %p1404_p7 = scmp.ne.s32.totalorder %s2035_s30, %s1403_s6  ;;  %s1408_s11 = sshll.u32 %s1741_s12, 4  ;;  %s1409_s11 = int_to_ptr.vmem [resolvable:$false] %s1408_s11 }
  0x78   : > { %s1410_s7 = scalar_lea.vmem %s1409_s11, 512  ;;  %p1411_p10 = scmp.lt.s32.totalorder %s2035_s30, %s1409_s11 }
  0x79   : > { %p1406_p6 = pnand %p1404_p7, %p1390_p9  ;;  %p1412_p1 = scmp.lt.s32.totalorder %s1410_s7, %s1403_s6 }
  0x7b   : > { %p1407_p13 = pneg %p1406_p6  ;;  %p1413_p0 = por %p1412_p1, %p1411_p10 }
  0x7d   : > { %p1414_p4 = pnand %p1413_p0, %p1407_p13 }
  0x7f   : > { %1417 = shalt.err (!%p1414_p4)
}
  0x80   : > { %1177 = dma.hbm_to_vmem [thread:$0]  (!%p2041_p3), %s2033_s18, 256, %s2035_s30, %s266_s28  }
  0x81   : > { %s112_s10 = sadd.s32 1, %s1684_s26  ;;  %p119_p10 = scmp.ne.s32.totalorder %s1684_s26, %s1680_s25 }
  0x82   : > { %p2563_p13 = scmp.eq.s32.totalorder %s1974_s16, 0  ;;  %p2564_p2 = scmp.eq.s32.totalorder %s1736_s15, 0 }
  0x83   : > { %p125_p12 = scmp.ne.s32.totalorder %s1680_s25, %s1676_s24  ;;  %s2512_s2 = sand.u32 1, %s1684_s26  }
  0x84   : > { %s2076_s20 = scalar_select %p2563_p13, %s1684_s26, %s112_s10  }
  0x85   : > { %p121_p11 = por %p119_p10, %p2564_p2  ;;  %s2513_s17 = sshll.u32 %s1728_s13, 7 }
  0x86   : > { %p2565_p9 = scmp.eq.s32.totalorder %s1955_s9, 0  ;;  %s2092_s27 = sshll.u32 %s2512_s2, 3 }
  0x87   : > { %s2567_s28 = sld [smem:[#allocation40_spill]]  ;;  %s311_s24 = scalar_lea.vmem [#allocation7], %s2092_s27 }
  0x88   : > { %p2086_p8 = por %p125_p12, %p2565_p9  ;;  %s318_s12 = sshll.u32 %s311_s24, 4  ;;  %s319_s12 = int_to_ptr.vmem [resolvable:$true] %s318_s12 }
  0x89   : > { %p2569_p3 = scmp.lt.s32.totalorder %s1736_s15, 8 }
  0x8a   : > { %s2566_s29 = scalar_select %p2086_p8, 1, 0 }
  0x8b   : > { %p2104_p7 = pnand %p2569_p3, %p121_p11 }
  0x8d   : > { %s2568_s6 = smov %s2567_s28  ;;  %s2099_s16 = scalar_lea.hbm %s2567_s28, %s2513_s17 }
  0x8e   : > { %s1418_s7 = scalar_lea.hbm %s2099_s16, 128  ;;  %p1420_p1 = pneg %p2104_p7 }
  0x8f   : > { %p1419_p6 = scmp.ne.s32.totalorder %s2099_s16, %s1418_s7  ;;  %s1423_s18 = scalar_lea.hbm %s2568_s6, 256 }
  0x90   : > { %p1424_p10 = scmp.lt.u32.totalorder %s2099_s16, %s2568_s6  ;;  %p1425_p13 = scmp.lt.u32.totalorder %s1423_s18, %s1418_s7 }
  0x91   : > { %p1421_p0 = pnand %p1420_p1, %p1419_p6  ;;  %p1427_p11 = scmp.lt.u32.totalorder %s1418_s7, %s2099_s16 }
  0x92   : > { %p1426_p2 = por %p1425_p13, %p1424_p10 }
  0x93   : > { %p1422_p4 = pneg %p1421_p0 }
  0x94   : > { %p1428_p12 = por %p1427_p11, %p1426_p2 }
  0x96   : > { %p1429_p9 = pnand %p1428_p12, %p1422_p4 }
  0x98   : > { %1432 = shalt.err (!%p1429_p9)
}
  0x99   : > { %s1433_s2 = scalar_lea.vmem %s319_s12, 128  ;;  %s1742_s17 = smov [#allocation7]  }
  0x9a   : > { %p1434_p3 = scmp.ne.s32.totalorder %s319_s12, %s1433_s2  ;;  %s1438_s10 = sshll.u32 %s1742_s17, 4  ;;  %s1439_s10 = int_to_ptr.vmem [resolvable:$false] %s1438_s10 }
  0x9b   : > { %s1440_s30 = scalar_lea.vmem %s1439_s10, 256  ;;  %p1441_p8 = scmp.lt.s32.totalorder %s319_s12, %s1439_s10 }
  0x9c   : > { %p1436_p6 = pnand %p1434_p3, %p1420_p1  ;;  %p1442_p5 = scmp.lt.s32.totalorder %s1440_s30, %s1433_s2 }
  0x9e   : > { %p1437_p0 = pneg %p1436_p6  ;;  %p1443_p10 = por %p1442_p5, %p1441_p8 }
  0xa0   : > { %p1444_p13 = pnand %p1443_p10, %p1437_p0 }
  0xa2   : > { %1447 = shalt.err (!%p1444_p13)
}
  0xa3   : > { %1183 = dma.hbm_to_vmem [thread:$0]  (!%p2104_p7), %s2099_s16, 128, %s319_s12, %s1920_s4  }
  0xa4   : > { %s2571_s7 = sshll.u32 %s1728_s13, 7  ;;  %s2572_s17 = sld [smem:[#allocation41_spill]] }
  0xa5   : > { %s329_s2 = scalar_lea.vmem [#allocation8], %s2092_s27  ;;  %s2573_s30 = sand.u32 1, %s1684_s26  }
  0xa6   : > { %s336_s10 = sshll.u32 %s329_s2, 4  ;;  %s326_s0 = scalar_lea.sflag [#allocation9], %s2573_s30  ;;  %s337_s10 = int_to_ptr.vmem [resolvable:$true] %s336_s10 }
  0xaa   : > { %s2135_s24 = scalar_lea.hbm %s2572_s17, %s2571_s7  ;;  %s1453_s12 = scalar_lea.hbm %s2572_s17, 256 }
  0xab   : > { %s1448_s6 = scalar_lea.hbm %s2135_s24, 128  ;;  %p1454_p2 = scmp.lt.u32.totalorder %s2135_s24, %s2572_s17 }
  0xac   : > { %p1449_p5 = scmp.ne.s32.totalorder %s2135_s24, %s1448_s6  ;;  %p1455_p11 = scmp.lt.u32.totalorder %s1453_s12, %s1448_s6 }
  0xad   : > { %p1457_p9 = scmp.lt.u32.totalorder %s1448_s6, %s2135_s24 }
  0xae   : > { %p1451_p8 = pnand %p1449_p5, %p1420_p1  ;;  %p1456_p12 = por %p1455_p11, %p1454_p2 }
  0xb0   : > { %p1452_p4 = pneg %p1451_p8  ;;  %p1458_p3 = por %p1457_p9, %p1456_p12 }
  0xb2   : > { %p1459_p6 = pnand %p1458_p3, %p1452_p4 }
  0xb4   : > { %1462 = shalt.err (!%p1459_p6)
}
  0xb5   : > { %s1463_s27 = scalar_lea.vmem %s337_s10, 128  ;;  %s1743_s28 = smov [#allocation8]  }
  0xb6   : > { %p1464_p0 = scmp.ne.s32.totalorder %s337_s10, %s1463_s27  ;;  %s1468_s2 = sshll.u32 %s1743_s28, 4  ;;  %s1469_s2 = int_to_ptr.vmem [resolvable:$false] %s1468_s2 }
  0xb7   : > { %s1470_s30 = scalar_lea.vmem %s1469_s2, 256  ;;  %p1471_p5 = scmp.lt.s32.totalorder %s337_s10, %s1469_s2 }
  0xb8   : > { %p1466_p10 = pnand %p1464_p0, %p1420_p1  ;;  %p1472_p8 = scmp.lt.s32.totalorder %s1470_s30, %s1463_s27 }
  0xba   : > { %p1467_p13 = pneg %p1466_p10  ;;  %p1473_p2 = por %p1472_p8, %p1471_p5 }
  0xbc   : > { %p1474_p11 = pnand %p1473_p2, %p1467_p13 }
  0xbe   : > { %1477 = shalt.err (!%p1474_p11)
}
  0xbf   : > { %1186 = dma.hbm_to_vmem [thread:$0]  (!%p2104_p7), %s2135_s24, 128, %s337_s10, %s326_s0  }
  0xc0   : > { %p2574_p4 = scmp.ne.s32.totalorder %s2545_s3, 0 }
  0xc1   : > { %s2575_s6 = sld [smem:[#allocation22_spill]] (!%p2574_p4)  ;;  %s2576_s4 = sld [smem:[#allocation33_spill]] (!%p2574_p4) }
  0xc2   : > { %345 = sbr.rel (%p2574_p4) target bundleno = 846 (0x34e), region = 36 }
  0xc7   : > { %s347_s16 = sand.u32 (!%p2574_p4), 1, %s2575_s6   ;;  %p2577_p1 = scmp.ne.s32.totalorder (!%p2574_p4), %s2576_s4, 0 }
  0xc8   : > { %s2162_s12 = sshll.u32 (!%p2574_p4), %s347_s16, 4  ;;  %s348_s7 = scalar_lea.sflag (!%p2574_p4), [#allocation3], %s347_s16 }
  0xc9   : > { %s351_s18 = scalar_lea.vmem [#allocation2], %s2162_s12 }
  0xca   : > { %1639 = dma.done.wait (%p2577_p1), %s348_s7, 256  }
  0xcb   : > { %1641 = vsyncadd (%p2577_p1), %s348_s7, 4294967040  ;;  %s2578_s11 = sld [smem:[#allocation20_spill]]  ;;  %s2517_s24 = sand.u32 1, %s1955_s9  }
  0xcc   : > { %s2579_s0 = sld [smem:[#allocation34_spill]]  ;;  %s357_s27 = scalar_lea.sflag [#allocation6], %s2517_s24 }
  0xd1   : > { %s358_s3 = sand.u32 1, %s2578_s11  }
  0xd2   : > { %s1159_s10 = smul.u32 768, %s358_s3  ;;  %p2580_p7 = scmp.ne.s32.totalorder %s2579_s0, 0 }
  0xd4   : > { %s2173_s28 = scalar_lea.vmem [#allocation5], %s1159_s10 }
  0xd5   : > { %1643 = dma.done.wait (%p2580_p7), %s357_s27, 12288  }
  0xd6   : > { %1645 = vsyncadd (%p2580_p7), %s357_s27, 4294955008  ;;  %s367_s2 = sand.u32 1, %s1680_s25   ;;  %p2581_p12 = scmp.ne.s32.totalorder %s2566_s29, 0 }
  0xd7   : > { %s2180_s30 = sshll.u32 %s367_s2, 3 }
  0xd8   : > { %s369_s6 = scalar_lea.vmem [#allocation7], %s2180_s30 }
  0xd9   : > { %1647 = dma.done.wait (%p2581_p12), %s357_s27, 128  }
  0xda   : > { %1649 = vsyncadd (%p2581_p12), %s357_s27, 4294967168  ;;  %s375_s4 = scalar_lea.sflag [#allocation9], %s367_s2  ;;  %s378_s16 = scalar_lea.vmem [#allocation8], %s2180_s30 }
  0xdb   : > { %1651 = dma.done.wait (%p2581_p12), %s375_s4, 128  }
  0xdc   : > { %1653 = vsyncadd (%p2581_p12), %s375_s4, 4294967168  ;;  %v435_v0 = vld [vmem:[%s2173_s28 + $0x8] sm:$0xff]  ;;  %v438_v1 = vld [vmem:[%s2173_s28 + $0x20] sm:$0xff]  ;;  %s1744_s29 = smov 64   ;;  %s2582_s12 = sld [smem:[#allocation24_spill]] }
  0xdd   : > { %v434_v2 = vld [vmem:[%s2173_s28] sm:$0xff]  ;;  %v1061_v3 = vpack.c.bf16 %v438_v1, %v435_v0  ;;  %v437_v4 = vld [vmem:[%s2173_s28 + $0x18] sm:$0xff]  ;;  %v444_v6 = vld [vmem:[%s2173_s28 + $0x50] sm:$0xff]  ;;  %s2583_s7 = sld [smem:[#allocation25_spill]]  ;;  %s2516_s11 = sand.u32 1, %s1668_s22  }
  0xde   : > { %v441_v5 = vld [vmem:[%s2173_s28 + $0x38] sm:$0xff]  ;;  %v1063_v7 = vpack.c.bf16 %v437_v4, %v434_v2  ;;  %v440_v9 = vld [vmem:[%s2173_s28 + $0x30] sm:$0xff]  ;;  %v443_v10 = vld [vmem:[%s2173_s28 + $0x48] sm:$0xff]  ;;  %s2307_s0 = sshll.u32 %s2516_s11, 3  ;;  %s2587_s17 = sld [smem:[#allocation44_spill]] }
  0xdf   : > { %v1065_v8 = vpack.c.bf16 %v444_v6, %v441_v5  ;;  %v447_v11 = vld [vmem:[%s2173_s28 + $0x68] sm:$0xff]  ;;  %1062 = vmatprep.subr.bf16.mxu0 %v1061_v3  ;;  %v450_v12 = vld [vmem:[%s2173_s28 + $0x80] sm:$0xff]  ;;  %v1067_v13 = vpack.c.bf16 %v443_v10, %v440_v9  ;;  %v449_v16 = vld [vmem:[%s2173_s28 + $0x78] sm:$0xff]  ;;  %s431_s3 = scalar_lea.vmem [#allocation13], %s2307_s0  ;;  %s424_s30 = scalar_lea.vmem [#allocation11], %s2307_s0 }
  0xe0   : > { %1064 = vmatpush1.bf16.msra.mxu0 %v1063_v7  ;;  %v1069_v14 = vpack.c.bf16 %v450_v12, %v447_v11  ;;  %v446_v15 = vld [vmem:[%s2173_s28 + $0x60] sm:$0xff]  ;;  %v453_v17 = vld [vmem:[%s2173_s28 + $0x98] sm:$0xff]  ;;  %v456_v18 = vld [vmem:[%s2173_s28 + $0xb0] sm:$0xff]  ;;  %s2522_s11 = scalar_lea.vmem [#allocation10], %s2307_s0  ;;  %s2588_s13 = sld [smem:[#allocation42_spill]] }
  0xe1   : > { %1066 = vmatprep.subr.bf16.mxu0 %v1065_v8  ;;  %v1071_v19 = vpack.c.bf16 %v449_v16, %v446_v15  ;;  %v1073_v20 = vpack.c.bf16 %v456_v18, %v453_v17  ;;  %v452_v21 = vld [vmem:[%s2173_s28 + $0x90] sm:$0xff]  ;;  %v455_v22 = vld [vmem:[%s2173_s28 + $0xa8] sm:$0xff]  ;;  %v462_v24 = vld [vmem:[%s2173_s28 + $0xe0] sm:$0xff]  ;;  %s2590_s24 = sand.u32 1, %s1955_s9  }
  0xe2   : > { %v459_v23 = vld [vmem:[%s2173_s28 + $0xc8] sm:$0xff]  ;;  %v1075_v25 = vpack.c.bf16 %v455_v22, %v452_v21  ;;  %v458_v27 = vld [vmem:[%s2173_s28 + $0xc0] sm:$0xff]  ;;  %v461_v28 = vld [vmem:[%s2173_s28 + $0xd8] sm:$0xff]  ;;  %s1015_s10 = sshll.u32 %s2582_s12, 1  ;;  %s729_s12 = sshll.u32 %s2522_s11, 4  ;;  %s2336_s12 = int_to_ptr.vmem [resolvable:$true] %s729_s12 }
  0xe3   : > { %v1077_v26 = vpack.c.bf16 %v462_v24, %v459_v23  ;;  %v465_v29 = vld [vmem:[%s2173_s28 + $0xf8] sm:$0xff]  ;;  %v468_v30 = vld [vmem:[%s2173_s28 + $0x110] sm:$0xff]  ;;  %v1079_v31 = vpack.c.bf16 %v461_v28, %v458_v27  ;;  %v467_v34 = vld [vmem:[%s2173_s28 + $0x108] sm:$0xff]  ;;  %s723_s27 = sadd.s32 %s2583_s7, %s1015_s10  ;;  %s2340_s7 = scalar_lea.sflag [#allocation12], %s2590_s24 }
  0xe4   : > { %1068 = vmatpush1.bf16.msra.mxu0 %v1067_v13  ;;  %v1081_v32 = vpack.c.bf16 %v468_v30, %v465_v29  ;;  %v464_v33 = vld [vmem:[%s2173_s28 + $0xf0] sm:$0xff]  ;;  %v471_v35 = vld [vmem:[%s2173_s28 + $0x128] sm:$0xff]  ;;  %v474_v36 = vld [vmem:[%s2173_s28 + $0x140] sm:$0xff] }
  0xe5   : > { %1070 = vmatprep.subr.bf16.mxu0 %v1069_v14  ;;  %v1083_v37 = vpack.c.bf16 %v467_v34, %v464_v33  ;;  %v1085_v38 = vpack.c.bf16 %v474_v36, %v471_v35  ;;  %v470_v39 = vld [vmem:[%s2173_s28 + $0x120] sm:$0xff]  ;;  %v473_v40 = vld [vmem:[%s2173_s28 + $0x138] sm:$0xff]  ;;  %v480_v43 = vld [vmem:[%s2173_s28 + $0x170] sm:$0xff] }
  0xe6   : > { %v433_v41 = vld [vmem:[%s351_s18 + $0x8] sm:$0xff]  ;;  %v1087_v44 = vpack.c.bf16 %v473_v40, %v470_v39  ;;  %v476_v46 = vld [vmem:[%s2173_s28 + $0x150] sm:$0xff]  ;;  %v486_v49 = vld [vmem:[%s2173_s28 + $0x1a0] sm:$0xff]  ;;  %s2589_s1 = smov %s2588_s13 }
  0xe7   : > { %v477_v42 = vld [vmem:[%s2173_s28 + $0x158] sm:$0xff]  ;;  %594 = vmatprep.mubr.f32.mxu0 %v433_v41  ;;  %665 = vmatprep.mubr.f32.mxu1 %v433_v41  ;;  %v479_v47 = vld [vmem:[%s2173_s28 + $0x168] sm:$0xff]  ;;  %v482_v52 = vld [vmem:[%s2173_s28 + $0x180] sm:$0xff] }
  0xe8   : > { %1072 = vmatpush1.bf16.msra.mxu0 %v1071_v19  ;;  %v1089_v45 = vpack.c.bf16 %v480_v43, %v477_v42  ;;  %v483_v48 = vld [vmem:[%s2173_s28 + $0x188] sm:$0xff]  ;;  %v1091_v50 = vpack.c.bf16 %v479_v47, %v476_v46  ;;  %v485_v53 = vld [vmem:[%s2173_s28 + $0x198] sm:$0xff]  ;;  %v492_v55 = vld [vmem:[%s2173_s28 + $0x1d0] sm:$0xff] }
  0xe9   : > { %1074 = vmatprep.subr.bf16.mxu0 %v1073_v20  ;;  %v1093_v51 = vpack.c.bf16 %v486_v49, %v483_v48  ;;  %v489_v54 = vld [vmem:[%s2173_s28 + $0x1b8] sm:$0xff]  ;;  %v1095_v56 = vpack.c.bf16 %v485_v53, %v482_v52  ;;  %v488_v58 = vld [vmem:[%s2173_s28 + $0x1b0] sm:$0xff]  ;;  %v491_v59 = vld [vmem:[%s2173_s28 + $0x1c8] sm:$0xff] }
  0xea   : > { %v1097_v57 = vpack.c.bf16 %v492_v55, %v489_v54  ;;  %v495_v60 = vld [vmem:[%s2173_s28 + $0x1e8] sm:$0xff]  ;;  %v498_v61 = vld [vmem:[%s2173_s28 + $0x200] sm:$0xff]  ;;  %v1099_v62 = vpack.c.bf16 %v491_v59, %v488_v58  ;;  %v497_v1 = vld [vmem:[%s2173_s28 + $0x1f8] sm:$0xff] }
  0xeb   : > { %v1101_v63 = vpack.c.bf16 %v498_v61, %v495_v60  ;;  %v494_v0 = vld [vmem:[%s2173_s28 + $0x1e0] sm:$0xff]  ;;  %v501_v2 = vld [vmem:[%s2173_s28 + $0x218] sm:$0xff]  ;;  %v504_v3 = vld [vmem:[%s2173_s28 + $0x230] sm:$0xff] }
  0xec   : > { %1076 = vmatpush1.bf16.msra.mxu0 %v1075_v25  ;;  %v1103_v4 = vpack.c.bf16 %v497_v1, %v494_v0  ;;  %v1105_v5 = vpack.c.bf16 %v504_v3, %v501_v2  ;;  %v500_v6 = vld [vmem:[%s2173_s28 + $0x210] sm:$0xff]  ;;  %v503_v7 = vld [vmem:[%s2173_s28 + $0x228] sm:$0xff]  ;;  %v510_v9 = vld [vmem:[%s2173_s28 + $0x260] sm:$0xff] }
  0xed   : > { %1078 = vmatprep.subr.bf16.mxu0 %v1077_v26  ;;  %v507_v8 = vld [vmem:[%s2173_s28 + $0x248] sm:$0xff]  ;;  %v1107_v10 = vpack.c.bf16 %v503_v7, %v500_v6  ;;  %v506_v12 = vld [vmem:[%s2173_s28 + $0x240] sm:$0xff]  ;;  %v509_v13 = vld [vmem:[%s2173_s28 + $0x258] sm:$0xff] }
  0xee   : > { %v1109_v11 = vpack.c.bf16 %v510_v9, %v507_v8  ;;  %v513_v14 = vld [vmem:[%s2173_s28 + $0x278] sm:$0xff]  ;;  %v516_v15 = vld [vmem:[%s2173_s28 + $0x290] sm:$0xff]  ;;  %v1111_v16 = vpack.c.bf16 %v509_v13, %v506_v12  ;;  %v515_v19 = vld [vmem:[%s2173_s28 + $0x288] sm:$0xff] }
  0xef   : > { %v1113_v17 = vpack.c.bf16 %v516_v15, %v513_v14  ;;  %v512_v18 = vld [vmem:[%s2173_s28 + $0x270] sm:$0xff]  ;;  %v519_v20 = vld [vmem:[%s2173_s28 + $0x2a8] sm:$0xff]  ;;  %v522_v21 = vld [vmem:[%s2173_s28 + $0x2c0] sm:$0xff] }
  0xf0   : > { %1080 = vmatpush1.bf16.msra.mxu0 %v1079_v31  ;;  %v1115_v22 = vpack.c.bf16 %v515_v19, %v512_v18  ;;  %v1117_v23 = vpack.c.bf16 %v522_v21, %v519_v20  ;;  %v518_v24 = vld [vmem:[%s2173_s28 + $0x2a0] sm:$0xff]  ;;  %v521_v25 = vld [vmem:[%s2173_s28 + $0x2b8] sm:$0xff]  ;;  %v528_v27 = vld [vmem:[%s2173_s28 + $0x2f0] sm:$0xff] }
  0xf1   : > { %1082 = vmatprep.subr.bf16.mxu0 %v1081_v32  ;;  %v525_v26 = vld [vmem:[%s2173_s28 + $0x2d8] sm:$0xff]  ;;  %v1119_v28 = vpack.c.bf16 %v521_v25, %v518_v24  ;;  %v524_v30 = vld [vmem:[%s2173_s28 + $0x2d0] sm:$0xff]  ;;  %v527_v31 = vld [vmem:[%s2173_s28 + $0x2e8] sm:$0xff] }
  0xf2   : > { %v1121_v29 = vpack.c.bf16 %v528_v27, %v525_v26  ;;  %v1123_v32 = vpack.c.bf16 %v527_v31, %v524_v30  ;;  %v2260_v33 = vld [vmem:[%s351_s18] sm:$0xff]  ;;  %v487_v35 = vld [vmem:[%s2173_s28 + $0x1a8] sm:$0xff]  ;;  %v493_v40 = vld [vmem:[%s2173_s28 + $0x1d8] sm:$0xff]  ;;  %s2584_s18 = sld [smem:[#allocation26_spill]] }
  0xf3   : > { %v484_v34 = vld [vmem:[%s2173_s28 + $0x190] sm:$0xff]  ;;  %v490_v39 = vld [vmem:[%s2173_s28 + $0x1c0] sm:$0xff]  ;;  %v499_v46 = vld [vmem:[%s2173_s28 + $0x208] sm:$0xff] }
  0xf4   : > { %1084 = vmatpush1.bf16.msra.mxu0 %v1083_v37  ;;  %v436_v36 = vld [vmem:[%s2173_s28 + $0x10] sm:$0xff]  ;;  %v1125_v37 = vpack.c.bf16 %v487_v35, %v484_v34  ;;  %v1129_v42 = vpack.c.bf16 %v493_v40, %v490_v39  ;;  %v442_v43 = vld [vmem:[%s2173_s28 + $0x40] sm:$0xff]  ;;  %v505_v52 = vld [vmem:[%s2173_s28 + $0x238] sm:$0xff] }
  0xf5   : > { %1086 = vmatprep.subr.bf16.mxu0 %v1085_v38  ;;  %v439_v38 = vld [vmem:[%s2173_s28 + $0x28] sm:$0xff]  ;;  %v448_v49 = vld [vmem:[%s2173_s28 + $0x70] sm:$0xff]  ;;  %v454_v55 = vld [vmem:[%s2173_s28 + $0xa0] sm:$0xff] }
  0xf6   : > { %v1127_v41 = vpack.c.bf16 %v439_v38, %v436_v36  ;;  %1126 = vmatprep.subr.bf16.mxu1 %v1125_v37  ;;  %v511_v58 = vld [vmem:[%s2173_s28 + $0x268] sm:$0xff]  ;;  %v460_v61 = vld [vmem:[%s2173_s28 + $0xd0] sm:$0xff]  ;;  %v517_v0 = vld [vmem:[%s2173_s28 + $0x298] sm:$0xff] }
  0xf7   : > { %v466_v3 = vld [vmem:[%s2173_s28 + $0x100] sm:$0xff]  ;;  %v523_v6 = vld [vmem:[%s2173_s28 + $0x2c8] sm:$0xff]  ;;  %v472_v9 = vld [vmem:[%s2173_s28 + $0x130] sm:$0xff] }
  0xf8   : > { %1088 = vmatpush1.bf16.msra.mxu0 %v1087_v44  ;;  %v445_v44 = vld [vmem:[%s2173_s28 + $0x58] sm:$0xff]  ;;  %1128 = vmatpush3.bf16.msra.mxu1 %v1127_v41  ;;  %v478_v15 = vld [vmem:[%s2173_s28 + $0x160] sm:$0xff] }
  0xf9   : > { %1090 = vmatprep.subr.bf16.mxu0 %v1089_v45  ;;  %v496_v45 = vld [vmem:[%s2173_s28 + $0x1f0] sm:$0xff]  ;;  %v1131_v47 = vpack.c.bf16 %v445_v44, %v442_v43  ;;  %1130 = vmatprep.subr.bf16.mxu1 %v1129_v42  ;;  %v529_v12 = vld [vmem:[%s2173_s28 + $0x2f8] sm:$0xff]  ;;  %v671_v20 = vld [vmem:[%s369_s6] sm:$0xff]  ;;  %s746_s6 = sshll.u32 %s424_s30, 4  ;;  %s2314_s6 = int_to_ptr.vmem [resolvable:$true] %s746_s6 }
  0xfa   : > { %v1133_v48 = vpack.c.bf16 %v499_v46, %v496_v45  ;;  %v672_v21 = vld [vmem:[%s378_s16] sm:$0xff]  ;;  %s763_s16 = sshll.u32 %s431_s3, 4  ;;  %s1478_s11 = scalar_lea.vmem %s2314_s6, 128  ;;  %s2329_s16 = int_to_ptr.vmem [resolvable:$true] %s763_s16 }
  0xfb   : > { %p1479_p9 = scmp.ne.s32.totalorder %s2314_s6, %s1478_s11 }
  0xfc   : > { %1092 = vmatpush1.bf16.msra.mxu0 %v1091_v50  ;;  %v451_v50 = vld [vmem:[%s2173_s28 + $0x88] sm:$0xff]  ;;  %1132 = vmatpush3.bf16.msra.mxu1 %v1131_v47 }
  0xfd   : > { %1094 = vmatprep.subr.bf16.mxu0 %v1093_v51  ;;  %v502_v51 = vld [vmem:[%s2173_s28 + $0x220] sm:$0xff]  ;;  %v1135_v53 = vpack.c.bf16 %v451_v50, %v448_v49  ;;  %1134 = vmatprep.subr.bf16.mxu1 %v1133_v48 }
  0xfe   : > { %v1137_v54 = vpack.c.bf16 %v505_v52, %v502_v51 }
 0x100   : > { %1096 = vmatpush1.bf16.msra.mxu0 %v1095_v56  ;;  %v457_v56 = vld [vmem:[%s2173_s28 + $0xb8] sm:$0xff]  ;;  %1136 = vmatpush3.bf16.msra.mxu1 %v1135_v53 }
 0x101   : > { %1098 = vmatprep.subr.bf16.mxu0 %v1097_v57  ;;  %v508_v57 = vld [vmem:[%s2173_s28 + $0x250] sm:$0xff]  ;;  %v1139_v59 = vpack.c.bf16 %v457_v56, %v454_v55  ;;  %1138 = vmatprep.subr.bf16.mxu1 %v1137_v54 }
 0x102   : > { %v1141_v60 = vpack.c.bf16 %v511_v58, %v508_v57 }
 0x104   : > { %1100 = vmatpush1.bf16.msra.mxu0 %v1099_v62  ;;  %v463_v62 = vld [vmem:[%s2173_s28 + $0xe8] sm:$0xff]  ;;  %1140 = vmatpush3.bf16.msra.mxu1 %v1139_v59 }
 0x105   : > { %1102 = vmatprep.subr.bf16.mxu0 %v1101_v63  ;;  %v514_v63 = vld [vmem:[%s2173_s28 + $0x280] sm:$0xff]  ;;  %v1143_v1 = vpack.c.bf16 %v463_v62, %v460_v61  ;;  %1142 = vmatprep.subr.bf16.mxu1 %v1141_v60 }
 0x106   : > { %v1145_v2 = vpack.c.bf16 %v517_v0, %v514_v63 }
 0x108   : > { %1104 = vmatpush1.bf16.msra.mxu0 %v1103_v4  ;;  %v469_v4 = vld [vmem:[%s2173_s28 + $0x118] sm:$0xff]  ;;  %1144 = vmatpush3.bf16.msra.mxu1 %v1143_v1 }
 0x109   : > { %1106 = vmatprep.subr.bf16.mxu0 %v1105_v5  ;;  %v520_v5 = vld [vmem:[%s2173_s28 + $0x2b0] sm:$0xff]  ;;  %v1147_v7 = vpack.c.bf16 %v469_v4, %v466_v3  ;;  %1146 = vmatprep.subr.bf16.mxu1 %v1145_v2 }
 0x10a   : > { %v1149_v8 = vpack.c.bf16 %v523_v6, %v520_v5 }
 0x10c   : > { %1108 = vmatpush1.bf16.msra.mxu0 %v1107_v10  ;;  %v475_v10 = vld [vmem:[%s2173_s28 + $0x148] sm:$0xff]  ;;  %1148 = vmatpush3.bf16.msra.mxu1 %v1147_v7 }
 0x10d   : > { %1110 = vmatprep.subr.bf16.mxu0 %v1109_v11  ;;  %v526_v11 = vld [vmem:[%s2173_s28 + $0x2e0] sm:$0xff]  ;;  %v1151_v13 = vpack.c.bf16 %v475_v10, %v472_v9  ;;  %1150 = vmatprep.subr.bf16.mxu1 %v1149_v8 }
 0x10e   : > { %v1153_v14 = vpack.c.bf16 %v529_v12, %v526_v11 }
 0x110   : > { %1112 = vmatpush1.bf16.msra.mxu0 %v1111_v16  ;;  %v481_v16 = vld [vmem:[%s2173_s28 + $0x178] sm:$0xff]  ;;  %1152 = vmatpush3.bf16.msra.mxu1 %v1151_v13  ;;  %s1016_s28 = sshll.u32 %s2584_s18, 2  ;;  %s2586_s18 = sld [smem:[#allocation43_spill]] }
 0x111   : > { %1114 = vmatprep.subr.bf16.mxu0 %v1113_v17  ;;  %v1155_v17 = vpack.c.bf16 %v481_v16, %v478_v15  ;;  %1154 = vmatprep.subr.bf16.mxu1 %v1153_v14  ;;  %s725_s2 = sadd.s32 %s1016_s28, %s723_s27  ;;  %s1745_s27 = smov [#allocation11]  }
 0x112   : > { %s1017_s4 = sshll.u32 %s725_s2, 7  ;;  %s1482_s28 = sshll.u32 %s1745_s27, 4  ;;  %s1483_s28 = int_to_ptr.vmem [resolvable:$false] %s1482_s28 }
 0x113   : > { %s2334_s8 = scalar_lea.hbm %s2588_s13, %s1017_s4  ;;  %p1485_p10 = scmp.lt.s32.totalorder %s2314_s6, %s1483_s28 }
 0x114   : > { %1116 = vmatpush1.bf16.msra.mxu0 %v1115_v22  ;;  %1156 = vmatpush3.bf16.msra.mxu1 %v1155_v17 }
 0x115   : > { %1118 = vmatprep.subr.bf16.mxu0 %v1117_v23 }
 0x116   : > { %s2322_s10 = scalar_lea.hbm %s2586_s18, %s1017_s4 }
 0x117   : > { %666 = vmatmul.mubr.f32.vlgmr.msra.gmra.mrb[0].mxu1 %v2260_v33 }
 0x118   : > { %1120 = vmatpush1.bf16.msra.mxu0 %v1119_v28 }
 0x119   : > { %1122 = vmatprep.subr.bf16.mxu0 %v1121_v29 }
 0x11c   : > { %1124 = vmatpush1.bf16.msra.mxu0 %v1123_v32 }
 0x11f   : > { %595 = vmatmul.mubr.f32.vlgmr.msra.gmra.mrb[0].mxu0 %v2260_v33 }
 0x1ea   : > { %v1058_v32 = vpop.f32.mrb[0].mxu1 }
 0x1eb   : > { %v1059_v33 = vpop.f32.mrb[1].mxu1 }
 0x1ec   : > { %v1060_v34 = vadd.f32 %v1059_v33, %v1058_v32 }
 0x1ee   : > { %700 = vst [vmem:[%s431_s3] sm:$0xff] %v1060_v34  ;;  %s2327_s3 = scalar_lea.hbm %s2587_s17, %s1017_s4 }
 0x1f2   : > { %v596_v18 = vpop.f32.mrb[0].mxu0 }
 0x1f3   : > { %v598_v19 = vpop.f32.mrb[1].mxu0  ;;  %v673_v27 = vmul.f32 %v671_v20, %v596_v18 }
 0x1f4   : > { %687 = vrot.lane.b32.xlu0 %v598_v19, %s1744_s29  ;;  %v686_v23 = vmul.f32 %v671_v20, %v598_v19 }
 0x1f8   : > { %674 = vrot.lane.b32.xlu0 %v596_v18, %s1744_s29  ;;  %s2585_s29 = sld [smem:[#allocation36_spill]] }
 0x1fe   : > { %p2591_p3 = scmp.ne.s32.totalorder %s2585_s29, 0 }
 0x200   : > { %p1480_p6 = pnand %p1479_p9, %p2591_p3 }
 0x202   : > { %p1481_p0 = pneg %p1480_p6 }
 0x266   : > { %v688_v22 = vpop.permute.xlu0 %687 }
 0x267   : > { %v689_v24 = vmul.f32 %v688_v22, %v672_v21 }
 0x269   : > { %v690_v25 = vadd.f32 %v689_v24, %v686_v23 }
 0x26a   : > { %v675_v26 = vpop.permute.xlu0 %674 }
 0x26b   : > { %v676_v28 = vmul.f32 %v675_v26, %v672_v21  ;;  %v691_v29 = vmul.f32 %v690_v25, %v690_v25 }
 0x26d   : > { %v2300_v30 = vadd.f32 %v676_v28, %v673_v27  ;;  %692 = vadd.xlane.f32.xlu1 %v691_v29 }
 0x26f   : > { %v678_v31 = vmul.f32 %v2300_v30, %v2300_v30 }
 0x271   : > { %679 = vadd.xlane.f32.xlu1 %v678_v31 }
 0x2fa   : > { %v693_v35 = vpop.xlane.xlu1 %692 }
 0x2fb   : > { %v694_v36 = vmul.f32 0.0078125, %v693_v35 }
 0x2fd   : > { %v695_v37 = vadd.f32 1e-06, %v694_v36 }
 0x2fe   : > { %v680_v38 = vpop.xlane.xlu1 %679 }
 0x2ff   : > { %1354 = vrsqrt.f32 %v695_v37  ;;  %v682_v39 = vmul.f32 0.0078125, %v680_v38 }
 0x301   : > { %v683_v40 = vadd.f32 1e-06, %v682_v39 }
 0x303   : > { %1356 = vrsqrt.f32 %v683_v40 }
 0x309   : > { %v1355_v41 = vpop.eup %1354 }
 0x30a   : > { %v697_v42 = vmul.f32 %v1355_v41, %v690_v25 }
 0x30c   : > { %699 = vst [vmem:[%s424_s30] sm:$0xff] %v697_v42  ;;  %s1484_s30 = scalar_lea.vmem %s1483_s28, 256 }
 0x30d   : > { %v1357_v43 = vpop.eup %1356  ;;  %p1486_p13 = scmp.lt.s32.totalorder %s1484_s30, %s1478_s11 }
 0x30f   : > { %p1487_p5 = por %p1486_p13, %p1485_p10 }
 0x311   : > { %p1488_p8 = pnand %p1487_p5, %p1481_p0 }
 0x313   : > { %1491 = shalt.err (!%p1488_p8)
}
 0x314   : > { %s1492_s13 = scalar_lea.hbm %s2322_s10, 128  ;;  %s1496_s4 = scalar_lea.hbm %s2586_s18, 1024 }
 0x315   : > { %p1493_p2 = scmp.ne.s32.totalorder %s2322_s10, %s1492_s13  ;;  %p1497_p1 = scmp.lt.u32.totalorder %s2322_s10, %s2586_s18 }
 0x316   : > { %p1498_p7 = scmp.lt.u32.totalorder %s1496_s4, %s1492_s13  ;;  %p1500_p9 = scmp.lt.u32.totalorder %s1492_s13, %s2322_s10 }
 0x317   : > { %p1494_p11 = pnand %p1493_p2, %p2591_p3 }
 0x318   : > { %p1499_p12 = por %p1498_p7, %p1497_p1 }
 0x319   : > { %p1495_p4 = pneg %p1494_p11 }
 0x31a   : > { %p1501_p6 = por %p1500_p9, %p1499_p12 }
 0x31c   : > { %p1502_p0 = pnand %p1501_p6, %p1495_p4 }
 0x31e   : > { %1505 = shalt.err (!%p1502_p0)
}
 0x31f   : > { %1169 = dma.vmem_to_hbm [thread:$0]  (%p2591_p3), %s2314_s6, 128, %s2322_s10, %s2340_s7   ;;  %v685_v44 = vmul.f32 %v1357_v43, %v2300_v30 }
 0x320   : > { %s1506_s11 = scalar_lea.vmem %s2329_s16, 128  ;;  %s1746_s27 = smov [#allocation13]  }
 0x321   : > { %p1507_p10 = scmp.ne.s32.totalorder %s2329_s16, %s1506_s11  ;;  %s1510_s28 = sshll.u32 %s1746_s27, 4  ;;  %s1511_s28 = int_to_ptr.vmem [resolvable:$false] %s1510_s28 }
 0x322   : > { %s1512_s30 = scalar_lea.vmem %s1511_s28, 256  ;;  %p1513_p8 = scmp.lt.s32.totalorder %s2329_s16, %s1511_s28 }
 0x323   : > { %p1508_p13 = pnand %p1507_p10, %p2591_p3  ;;  %p1514_p2 = scmp.lt.s32.totalorder %s1512_s30, %s1506_s11 }
 0x325   : > { %p1509_p5 = pneg %p1508_p13  ;;  %p1515_p11 = por %p1514_p2, %p1513_p8 }
 0x327   : > { %p1516_p4 = pnand %p1515_p11, %p1509_p5 }
 0x329   : > { %1519 = shalt.err (!%p1516_p4)
}
 0x32a   : > { %s1520_s6 = scalar_lea.hbm %s2327_s3, 128  ;;  %s1524_s14 = scalar_lea.hbm %s2587_s17, 1024 }
 0x32b   : > { %p1521_p1 = scmp.ne.s32.totalorder %s2327_s3, %s1520_s6  ;;  %p1525_p9 = scmp.lt.u32.totalorder %s2327_s3, %s2587_s17 }
 0x32c   : > { %p1526_p6 = scmp.lt.u32.totalorder %s1524_s14, %s1520_s6  ;;  %p1528_p10 = scmp.lt.u32.totalorder %s1520_s6, %s2327_s3 }
 0x32d   : > { %p1522_p7 = pnand %p1521_p1, %p2591_p3 }
 0x32e   : > { %p1527_p0 = por %p1526_p6, %p1525_p9 }
 0x32f   : > { %p1523_p12 = pneg %p1522_p7 }
 0x330   : > { %p1529_p13 = por %p1528_p10, %p1527_p0 }
 0x332   : > { %p1530_p5 = pnand %p1529_p13, %p1523_p12 }
 0x334   : > { %1533 = shalt.err (!%p1530_p5)
}
 0x335   : > { %1170 = dma.vmem_to_hbm [thread:$0]  (%p2591_p3), %s2329_s16, 128, %s2327_s3, %s2340_s7  }
 0x336   : > { %s2592_s2 = scalar_lea.vmem [#allocation10], %s2307_s0  ;;  %s2593_s24 = sand.u32 1, %s1668_s22  }
 0x337   : > { %698 = vst [vmem:[%s2592_s2] sm:$0xff] %v685_v44  ;;  %s702_s11 = scalar_lea.sflag [#allocation4], %s2593_s24  ;;  %s1534_s27 = scalar_lea.vmem %s2336_s12, 128 }
 0x338   : > { %p1535_p8 = scmp.ne.s32.totalorder %s2336_s12, %s1534_s27  ;;  %s1747_s28 = smov [#allocation10]  }
 0x339   : > { %s1538_s30 = sshll.u32 %s1747_s28, 4  ;;  %s1539_s30 = int_to_ptr.vmem [resolvable:$false] %s1538_s30 }
 0x33a   : > { %p1536_p2 = pnand %p1535_p8, %p2591_p3  ;;  %s1540_s6 = scalar_lea.vmem %s1539_s30, 256 }
 0x33b   : > { %p1541_p4 = scmp.lt.s32.totalorder %s2336_s12, %s1539_s30  ;;  %p1542_p1 = scmp.lt.s32.totalorder %s1540_s6, %s1534_s27 }
 0x33c   : > { %p1537_p11 = pneg %p1536_p2 }
 0x33d   : > { %p1543_p7 = por %p1542_p1, %p1541_p4 }
 0x33f   : > { %p1544_p12 = pnand %p1543_p7, %p1537_p11 }
 0x341   : > { %1547 = shalt.err (!%p1544_p12)
}
 0x342   : > { %s1548_s0 = scalar_lea.hbm %s2334_s8, 128  ;;  %s1552_s7 = scalar_lea.hbm %s2589_s1, 1024 }
 0x343   : > { %p1549_p9 = scmp.ne.s32.totalorder %s2334_s8, %s1548_s0  ;;  %p1553_p10 = scmp.lt.u32.totalorder %s2334_s8, %s2589_s1 }
 0x344   : > { %p1554_p13 = scmp.lt.u32.totalorder %s1552_s7, %s1548_s0  ;;  %p1556_p8 = scmp.lt.u32.totalorder %s1548_s0, %s2334_s8 }
 0x345   : > { %p1550_p6 = pnand %p1549_p9, %p2591_p3 }
 0x346   : > { %p1555_p5 = por %p1554_p13, %p1553_p10 }
 0x347   : > { %p1551_p0 = pneg %p1550_p6 }
 0x348   : > { %p1557_p2 = por %p1556_p8, %p1555_p5 }
 0x34a   : > { %p1558_p11 = pnand %p1557_p2, %p1551_p0 }
 0x34c   : > { %1561 = shalt.err (!%p1558_p11)
}
 0x34d   : > { %1168 = dma.vmem_to_hbm [thread:$0]  (%p2591_p3), %s2336_s12, 128, %s2334_s8, %s702_s11  }
 0x34e PF: > { %p1198_p4 = scmp.ge.s32.totalorder %s1736_s15, 2  ;;  %s775_s14 = sand.u32 1, %s1664_s21  }
 0x34f   : > { %p2594_p1 = scmp.ne.s32.totalorder %s2559_s19, 0  ;;  %s776_s9 = scalar_lea.sflag [#allocation4], %s775_s14 }
 0x351   : > { %p1188_p7 = pnand %p1198_p4, %p2594_p1 }
 0x353   : > { %1655 = dma.done.wait (!%p1188_p7), %s776_s9, 128  }
 0x354   : > { %1657 = vsyncadd (!%p1188_p7), %s776_s9, 4294967168  ;;  %s2595_s4 = sadd.s32 4294967294, %s1736_s15  }
 0x355   : > { %s784_s2 = sand.u32 1, %s2595_s4  }
 0x356   : > { %s785_s24 = scalar_lea.sflag [#allocation12], %s784_s2 }
 0x357   : > { %1659 = dma.done.wait (!%p1188_p7), %s785_s24, 256  }
 0x358   : > { %1661 = vsyncadd (!%p1188_p7), %s785_s24, 4294967040  ;;  %s32_s15 = sadd.s32 1, %s1736_s15   ;;  %s2597_s27 = sld [smem:[#allocation20_spill]] }
 0x359   : > { %p2419_p3 = scmp.ge.s32.totalorder %s32_s15, 10   ;;  %s2598_s28 = sld [smem:[#allocation21_spill]] }
 0x35a   : > { %s2599_s29 = sld [smem:[#allocation31_spill]]  ;;  %s2600_s30 = sld [smem:[#allocation22_spill]] }
 0x35b   : > { %s2601_s7 = sld [smem:[#allocation23_spill]]  ;;  %s2603_s9 = sld [smem:[#allocation27_spill]] }
 0x35c   : > { %s2602_s19 = sld [smem:[#allocation37_spill]]  ;;  %s2604_s10 = sld [smem:[#allocation28_spill]] }
 0x35d   : > { %s2605_s11 = sld [smem:[#allocation29_spill]]  ;;  %s2606_s12 = sld [smem:[#allocation30_spill]] }
 0x35e   : > { %s2607_s21 = smov %s1668_s22  ;;  %s2608_s13 = sld [smem:[#allocation32_spill]] }
 0x35f   : > { %s2609_s22 = smov %s1672_s23  ;;  %s2610_s14 = sld [smem:[#allocation35_spill]] }
 0x360   : > { %s2611_s23 = smov %s2017_s5  ;;  %s2612_s24 = smov %s1680_s25 }
 0x361   : > { %s2614_s25 = smov %s1684_s26  ;;  %s2615_s26 = smov %s2076_s20 }
 0x362   : > { %s2616_s8 = smov %s2602_s19  ;;  %31 = sbr.rel (!%p2419_p3) target bundleno = 27 (0x1b), region = 150 }
 0x369   :  { %799 = vsyncpa [#allocation3], 1 }
 0x36a   :  { %801 = vsyncpa [#allocation3 + $0x1], 1 }
 0x36b   :  { %802 = vsyncpa [#allocation6], 1 }
 0x36c   :  { %804 = vsyncpa [#allocation6 + $0x1], 1 }
 0x36d   :  { %805 = vsyncpa [#allocation9], 1 }
 0x36e   :  { %807 = vsyncpa [#allocation9 + $0x1], 1 }
 0x36f   :  { %808 = vsyncpa [#allocation4], 1 }
 0x370   :  { %810 = vsyncpa [#allocation4 + $0x1], 1 }
 0x371   :  { %811 = vsyncpa [#allocation12], 1 }
 0x372   :  { %813 = vsyncpa [#allocation12 + $0x1], 1 }

</bundles_post_ra>
